<compile_context>
chip_gen: v5e
topology: v5e:2x2
jax: 0.10.0
libtpu: 0.0.40
codegen_flags: <defaults>
</compile_context>

<pallas_src>
import jax
import jax.numpy as jnp
from jax.experimental import pallas as pl
from jax.experimental.pallas import tpu as pltpu


def _cdiv(a, b):
    return -(-a // b)


def _round_up(x, m):
    return ((x + m - 1) // m) * m


def _vmem_capacity_bytes():
    try:
        return int(pltpu.get_tpu_info().vmem_capacity_bytes)
    except Exception:
        return 64 << 20  # conservative fallback (v7x per-TensorCore VMEM)


def _vmem_estimate(tn, F, itemsize):
    """Conservative per-step VMEM working-set estimate (bytes)."""
    return (2 * F * F * 4                  # resident W (allow double buffer)
            + 2 * 2 * tn * F * itemsize    # hd + hm tiles, double-buffered
            + 2 * tn * F * 4               # BOTH f32 intermediates (hd0, prod)
            + (tn * F * 4) // 2            # MXU result staging / relayout slack
            + 2 * tn * 4                   # (1, tn) f32 output row, double-buffered
            + (2 << 20))                   # Mosaic internal scratch margin


def _select_tile(N, F, itemsize, vmem_capacity):
    """Pick the sample-axis tile tn.  N is never padded; last block may be partial."""
    # Working-set budget: leave real headroom for Mosaic scratch / semaphores.
    budget = min(int(vmem_capacity * 0.72), vmem_capacity - (16 << 20))
    budget = max(budget, 8 << 20)
    fixed = _vmem_estimate(0, F, itemsize)
    per_row = _vmem_estimate(1, F, itemsize) - fixed
    tn_max = (budget - fixed) // per_row if budget > fixed else 8
    tn_max = max(8, min(tn_max, 8192))
    if N <= tn_max:
        # Single block spans the full (unpadded) sample axis: block dims equal
        # the array dims, so no 8/128 divisibility requirement applies.
        return N, 1
    # Multi-block: lane-dense (1, tn) output blocks need tn % 128 == 0; prefer
    # 256 alignment for the 2x256x256 MXU on v6e/v7x.
    align = 256 if tn_max >= 256 else 128
    tn_floor = max(align, (tn_max // align) * align)
    num_steps = _cdiv(N, tn_floor)
    # Spread rows evenly so the final (partial) block wastes < `align` rows.
    tn = min(_round_up(_cdiv(N, num_steps), align), tn_floor)
    return tn, _cdiv(N, tn)


def bilinear_decoder_kernel(hd_ref, hm_ref, w_ref, out_ref):
    # hd_ref / hm_ref: (tn, F), w_ref: (F, F), out_ref: (1, tn)
    hd = hd_ref[...]
    hm = hm_ref[...]
    w = w_ref[...]
    # h_diseases0 = h_diseases @ W   (MXU, f32 accumulate)
    hd0 = jnp.dot(hd, w, preferred_element_type=jnp.float32)
    # elementwise multiply (VPU, f32)
    prod = hd0 * hm.astype(jnp.float32)                       # (tn, F)
    # Row-reduce via a ones-vector NT matmul so the result is already a
    # lane-dense (1, tn) row: row[0, n] = sum_f prod[n, f].
    # TODO(synk): on v5e (128x128 MXU) this M=1 matmul roughly doubles MXU
    # pushes; switch to an XLU axis=-1 sum + relayout there if MXU-bound.
    ones_row = jnp.ones((1, prod.shape[1]), dtype=jnp.float32)
    row = jnp.einsum("kf,nf->kn", ones_row, prod,
                     preferred_element_type=jnp.float32)      # (1, tn)
    out_ref[...] = jax.nn.sigmoid(row).astype(out_ref.dtype)


def bilinear_decoder(h_diseases, h_metabolite, W, *, tile_rows=None):
    N, F = h_diseases.shape
    assert W.shape == (F, F)
    assert h_metabolite.shape == (N, F)

    itemsize = jnp.dtype(h_diseases.dtype).itemsize
    vmem_capacity = _vmem_capacity_bytes()

    if tile_rows is None:
        tn, steps = _select_tile(N, F, itemsize, vmem_capacity)
    else:
        tn = min(int(tile_rows), N)
        if tn < N:
            assert tn % 128 == 0, "multi-block tile_rows must be a multiple of 128"
        steps = _cdiv(N, tn)

    # Never silently clamp the VMEM request: shrink tn instead if the estimate
    # exceeds per-core capacity minus headroom.
    cap_limit = max(vmem_capacity - (8 << 20), 16 << 20)
    while steps > 1 and _vmem_estimate(tn, F, itemsize) > cap_limit and tn > 128:
        tn -= 128
        steps = _cdiv(N, tn)
    # TODO(synk): for very large F (f32 W approaching v7x's VMEM, F >~ 2500),
    # add a K grid axis marked "arbitrary" with an f32 accumulator (or stream
    # W as bf16) instead of keeping W resident.

    vmem_limit = int(min(max(_vmem_estimate(tn, F, itemsize), 32 << 20), cap_limit))

    cost = pl.CostEstimate(
        flops=2 * N * F * F + 2 * N * F + N * F,   # main matmul + reduce matmul + mul
        transcendentals=N,
        bytes_accessed=2 * N * F * itemsize + F * F * 4 + N * 4,
    )

    out_row = pl.pallas_call(
        bilinear_decoder_kernel,
        out_shape=jax.ShapeDtypeStruct((1, N), jnp.float32),
        grid_spec=pltpu.PrefetchScalarGridSpec(
            num_scalar_prefetch=0,
            grid=(steps,),
            in_specs=[
                pl.BlockSpec((tn, F), lambda i: (i, 0)),   # h_diseases tile
                pl.BlockSpec((tn, F), lambda i: (i, 0)),   # h_metabolite tile
                pl.BlockSpec((F, F), lambda i: (0, 0)),    # full W, resident
            ],
            out_specs=pl.BlockSpec((1, tn), lambda i: (0, i)),
        ),
        compiler_params=pltpu.CompilerParams(
            dimension_semantics=("parallel",),
            vmem_limit_bytes=vmem_limit,
        ),
        cost_estimate=cost,
    )(h_diseases, h_metabolite, W)

    # Lane-dense (1, N) row -> (N, 1) column (matches torch unsqueeze(1)).
    return out_row.reshape(N, 1)


def bilinear_decoder_ref(h_diseases, h_metabolite, W):
    h0 = jnp.sum((h_diseases @ W) * h_metabolite, axis=1)
    return jax.nn.sigmoid(h0)[:, None]


if __name__ == "__main__":
    # Small deterministic problem matching the module's forward.
    N, F = 16, 32
    k_w, k_hd, k_hm = jax.random.split(jax.random.PRNGKey(0), 3)
    W = jax.random.normal(k_w, (F, F), dtype=jnp.float32)
    h_diseases = jax.random.normal(k_hd, (N, F), dtype=jnp.float32)
    h_metabolite = jax.random.normal(k_hm, (N, F), dtype=jnp.float32)

    out = jax.block_until_ready(bilinear_decoder(h_diseases, h_metabolite, W))
    ref = bilinear_decoder_ref(h_diseases, h_metabolite, W)
    assert out.shape == (N, 1)
    assert jnp.allclose(out, ref, atol=1e-5, rtol=1e-5)

    # Second check: forces the multi-block path with a PARTIAL last block
    # (N % tile_rows != 0) and an N that is not a multiple of 128, so the
    # clamped tail DMA and masked output store are exercised without padding.
    N2, F2 = 2300, 128
    k_w2, k_hd2, k_hm2 = jax.random.split(jax.random.PRNGKey(1), 3)
    W2 = jax.random.normal(k_w2, (F2, F2), dtype=jnp.float32)
    hd2 = jax.random.normal(k_hd2, (N2, F2), dtype=jnp.float32)
    hm2 = jax.random.normal(k_hm2, (N2, F2), dtype=jnp.float32)

    out2 = jax.block_until_ready(
        bilinear_decoder(hd2, hm2, W2, tile_rows=256))
    ref2 = bilinear_decoder_ref(hd2, hm2, W2)
    assert out2.shape == (N2, 1)
    assert jnp.allclose(out2, ref2, atol=1e-3, rtol=1e-3)

    # Third check: auto tile selection (single large block, no padding).
    out3 = jax.block_until_ready(bilinear_decoder(hd2, hm2, W2))
    assert out3.shape == (N2, 1)
    assert jnp.allclose(out3, ref2, atol=1e-3, rtol=1e-3)

    print("KERNEL_OK")
</pallas_src>

<mosaic_0001>
module attributes {stable_mosaic.version = 11 : i64} {
  func.func @bilinear_decoder_kernel(%arg0: i32, %arg1: memref<16x32xf32, #tpu.memory_space<vmem>>, %arg2: memref<16x32xf32, #tpu.memory_space<vmem>>, %arg3: memref<32x32xf32, #tpu.memory_space<vmem>>, %arg4: memref<1x16xf32, #tpu.memory_space<vmem>>) attributes {dimension_semantics = [#tpu.dimension_semantics<parallel>], iteration_bounds = array<i64: 1>, scalar_prefetch = 0 : i64, scratch_operands = 0 : i64, tpu.core_type = #tpu.core_type<tc>, window_params = [{transform_indices = @transform_0, window_bounds = array<i64: 16, 32>}, {transform_indices = @transform_1, window_bounds = array<i64: 16, 32>}, {pipeline_mode = #tpu.pipeline_mode<synchronous>, transform_indices = @transform_2, window_bounds = array<i64: 32, 32>}, {transform_indices = @transform_3, window_bounds = array<i64: 1, 16>}]} {
    %c0 = arith.constant 0 : index
    %c0_0 = arith.constant 0 : index
    %0 = vector.load %arg1[%c0, %c0_0] : memref<16x32xf32, #tpu.memory_space<vmem>>, vector<16x32xf32>
    %c0_1 = arith.constant 0 : index
    %c0_2 = arith.constant 0 : index
    %1 = vector.load %arg2[%c0_1, %c0_2] : memref<16x32xf32, #tpu.memory_space<vmem>>, vector<16x32xf32>
    %c0_3 = arith.constant 0 : index
    %c0_4 = arith.constant 0 : index
    %2 = vector.load %arg3[%c0_3, %c0_4] : memref<32x32xf32, #tpu.memory_space<vmem>>, vector<32x32xf32>
    %cst = arith.constant dense<0.000000e+00> : vector<16x32xf32>
    %3 = tpu.matmul %0, %2, %cst {dimension_numbers = #tpu.dot_dimension_numbers<[1], [0], [0], [1], [0, 0, 1, 1], [], []>} : vector<16x32xf32>, vector<32x32xf32>, vector<16x32xf32> -> vector<16x32xf32>
    %4 = arith.mulf %3, %1 : vector<16x32xf32>
    %cst_5 = arith.constant 1.000000e+00 : f32
    %5 = vector.broadcast %cst_5 : f32 to vector<1x32xf32>
    "tpu.trace_start"() <{level = 10 : i32, message = "kf,nf->kn"}> : () -> ()
    %cst_6 = arith.constant dense<0.000000e+00> : vector<1x16xf32>
    %6 = tpu.matmul %5, %4, %cst_6 {dimension_numbers = #tpu.dot_dimension_numbers<[1], [1], [0], [0], [0, 0, 1, 0], [], []>} : vector<1x32xf32>, vector<16x32xf32>, vector<1x16xf32> -> vector<1x16xf32>
    "tpu.trace_stop"() : () -> ()
    %7 = arith.negf %6 : vector<1x16xf32>
    %8 = math.exp %7 : vector<1x16xf32>
    %cst_7 = arith.constant 1.000000e+00 : f32
    %9 = vector.broadcast %cst_7 : f32 to vector<1x16xf32>
    %10 = arith.addf %9, %8 : vector<1x16xf32>
    %11 = arith.divf %9, %10 : vector<1x16xf32>
    %c0_8 = arith.constant 0 : index
    %c0_9 = arith.constant 0 : index
    %12 = vector.load %arg4[%c0_8, %c0_9] : memref<1x16xf32, #tpu.memory_space<vmem>>, vector<1x16xf32>
    tpu.vector_store %arg4[%c0_8, %c0_9], %11 {strides = array<i32>} : memref<1x16xf32, #tpu.memory_space<vmem>>, vector<1x16xf32>,
    return
  }
  func.func @transform_0(%arg0: i32) -> (i32, i32) {
    %c0_i32 = arith.constant 0 : i32
    %c0_i32_0 = arith.constant 0 : i32
    return %arg0, %c0_i32 : i32, i32
  }
  func.func @transform_1(%arg0: i32) -> (i32, i32) {
    %c0_i32 = arith.constant 0 : i32
    %c0_i32_0 = arith.constant 0 : i32
    return %arg0, %c0_i32 : i32, i32
  }
  func.func @transform_2(%arg0: i32) -> (i32, i32) {
    %c0_i32 = arith.constant 0 : i32
    %c0_i32_0 = arith.constant 0 : i32
    %c0_i32_1 = arith.constant 0 : i32
    return %c0_i32, %c0_i32_0 : i32, i32
  }
  func.func @transform_3(%arg0: i32) -> (i32, i32) {
    %c0_i32 = arith.constant 0 : i32
    %c0_i32_0 = arith.constant 0 : i32
    return %c0_i32, %arg0 : i32, i32
  }
}

</mosaic_0001>

<bundles_post_ra>
// kernel: tpu_custom_call.1
= control target key start
LH: loop header
LB: loop body
LE: loop exit
PB: predicated region body
PF: predicated region fallthrough
CT: control target
= control target key end

     0   :  { %8 = vsyncpa [#allocation3], 0  ;;  %s337_s0 = inlined_call_operand.hbm [shape: f32[16,32], index: 0, kind: input, shape index: {}]   ;;  %s338_s1 = inlined_call_operand.hbm [shape: f32[16,32], index: 1, kind: input, shape index: {}]   ;;  %s339_s2 = inlined_call_operand.hbm [shape: f32[32,32], index: 2, kind: input, shape index: {}]   ;;  %s340_s3 = inlined_call_operand.hbm [shape: f32[1,16], index: 3, kind: output, shape index: {}]  }
   0x1   :  { %9 = vsyncpa [#allocation6], 0 }
   0x2   :  { %10 = vsyncpa [#allocation4], 0  ;;  %s28_s14 = sshll.u32 %s338_s1, 4  ;;  %s293_s15 = smov [#allocation5]   ;;  %s29_s14 = int_to_ptr.hbm [resolvable:$true] %s28_s14 }
   0x3   :  { %s30_s16 = sshll.u32 %s293_s15, 4  ;;  %s15_s19 = sshll.u32 %s337_s0, 4  ;;  %s31_s16 = int_to_ptr.vmem [resolvable:$true] %s30_s16  ;;  %s16_s19 = int_to_ptr.hbm [resolvable:$true] %s15_s19 }
   0x4   :  { %s294_s20 = smov 128   ;;  %s295_s21 = smov 8  }
   0x5   :  { %36 = dma.hbm_to_vmem [thread:$0]  %s29_s14, 256, %s31_s16, [#allocation6], %s294_s20, %s294_s20, %s295_s21  }
   0x6   :  { %s296_s22 = smov [#allocation2]   ;;  %s41_s26 = sshll.u32 %s339_s2, 4  ;;  %s42_s26 = int_to_ptr.hbm [resolvable:$true] %s41_s26 }
   0x7   :  { %s17_s23 = sshll.u32 %s296_s22, 4  ;;  %s297_s1 = smov [#allocation7]   ;;  %s18_s23 = int_to_ptr.vmem [resolvable:$true] %s17_s23 }
   0x8   :  { %23 = dma.hbm_to_vmem [thread:$0]  %s16_s19, 256, %s18_s23, [#allocation3], %s294_s20, %s294_s20, %s295_s21  }
   0x9   :  { %s43_s27 = sshll.u32 %s297_s1, 4  ;;  %s44_s27 = int_to_ptr.vmem [resolvable:$true] %s43_s27 }
   0xa   :  { %49 = dma.hbm_to_vmem [thread:$0]  %s42_s26, 512, %s44_s27, [#allocation6], %s294_s20, %s294_s20, %s295_s21  }
   0xb   :  { %287 = dma.done.wait [#allocation3], 256  }
   0xc   :  { %288 = vsyncadd [#allocation3], 4294967040 }
   0xd   :  { %289 = dma.done.wait [#allocation6], 768  }
   0xe   :  { %290 = vsyncadd [#allocation6], 4294966528  ;;  %v69_v0 = vld [vmem:[#allocation7 + $0x18] sm:$0xff]  ;;  %v68_v1 = vld [vmem:[#allocation7 + $0x10] sm:$0xff]  ;;  %vm70_vm0 = vcmask 261120   ;;  %v298_v12 = vmov 1.0  }
   0xf   :  { %176 = vmatpush.msra.mxu2 %v69_v0  ;;  %89 = vmatpush.msra.mxu0 %v69_v0  ;;  %v67_v2 = vld [vmem:[#allocation7 + $0x8] sm:$0xff]  ;;  %v66_v3 = vld [vmem:[#allocation7] sm:$0xff]  ;;  %v65_v6 = vld [vmem:[#allocation5 + $0x8] sm:$0xff]  ;;  %s299_s0 = smov [#allocation8]   ;;  %s159_s30 = sshll.u32 %s340_s3, 4  ;;  %vm150_vm4 = vcmask 122880   ;;  %s160_s30 = int_to_ptr.hbm [resolvable:$true] %s159_s30 }
  0x10   :  { %v63_v4 = vld [vmem:[#allocation2 + $0x8] sm:$0xff]  ;;  %v62_v5 = vld [vmem:[#allocation2] sm:$0xff]  ;;  %v64_v8 = vld [vmem:[#allocation5] sm:$0xff]  ;;  %s157_s2 = sshll.u32 %s299_s0, 4  ;;  %s158_s2 = int_to_ptr.vmem [resolvable:$true] %s157_s2 }
  0x11   :  { %177 = vmatpush.msra.mxu2 %v68_v1  ;;  %90 = vmatpush.msra.mxu0 %v68_v1 }
  0x13   :  { %178 = vmatpush.msra.mxu2 %v67_v2  ;;  %91 = vmatpush.msra.mxu0 %v67_v2 }
  0x15   :  { %179 = vmatpush.msra.mxu2 %v66_v3  ;;  %92 = vmatpush.msra.mxu0 %v66_v3 }
  0x16   :  { %171 = vmatmul.msk.f32.vlgmr.msra.gmra.mxu2 %vm70_vm0, %v63_v4  ;;  %170 = vmatmul.msk.f32.vlgmr.msra.gmra.mxu0 %vm70_vm0, %v62_v5 }
  0x93   :  { %v94_v9 = vpop.f32.mrf.mxu0 }
  0x94   :  { %v100_v11 = vmul.f32 %v94_v9, %v64_v8 }
  0x99   :  { %v97_v7 = vpop.f32.mrf.mxu2 }
  0x9a   :  { %v101_v10 = vmul.f32 %v97_v7, %v65_v6 }
  0x9c   :  { %172 = vmatpush.xpose.msk.msra.mxu1 %vm70_vm0, %v101_v10 }
  0xa0   :  { %173 = vmatpush.xpose.msk.msra.mxu1 %vm70_vm0, %v100_v11 }
  0xa3   :  { %174 = vmatmul.msk.f32.vlgmr.msra.gmra.mxu1 %vm70_vm0, %v298_v12 }
 0x120   :  { %v128_v13 = vpop.f32.mrf.mxu1 }
 0x121   :  { %v175_v14 = vmul.f32 -1.442695, %v128_v13 }
 0x123   :  { %187 = vpow2.f32 %v175_v14 }
 0x129   :  { %v188_v15 = vpop.eup %187 }
 0x12a   :  { %v134_v16 = vadd.f32 1.0, %v188_v15 }
 0x12c   :  { %189 = vrcp.f32 %v134_v16  ;;  %v146_v20 = vand.u32 2147483648, %v134_v16  ;;  %v144_v22 = vand.u32 2147483647, %v134_v16  ;;  %vm140_vm2 = vweird.f32 %v134_v16 }
 0x12e   :  { %v147_v24 = vor.u32 1.1754944e-38, %v146_v20  ;;  %vm145_vm5 = vcmp.eq.f32.partialorder %v144_v22, 8.507059e+37 }
 0x132   :  { %v190_v17 = vpop.eup %189 }
 0x133   :  { %v136_v18 = vmul.f32 %v190_v17, %v134_v16  ;;  %vm141_vm1 = vweird.f32 %v190_v17 }
 0x134   :  { %vm142_vm3 = vmor %vm140_vm2, %vm141_vm1 }
 0x135   :  { %v137_v19 = vsub.f32 1.0, %v136_v18 }
 0x137   :  { %v138_v21 = vmul.f32 %v190_v17, %v137_v19 }
 0x139   :  { %v139_v23 = vadd.f32 %v190_v17, %v138_v21 }
 0x13b   :  { %v143_v25 = vsel %vm142_vm3, %v190_v17, %v139_v23 }
 0x13c   :  { %v148_v26 = vsel %vm145_vm5, %v147_v24, %v143_v25 }
 0x13d   :  { %151 = vst.msk [vmem:[#allocation8] sm:$0x1] %vm150_vm4, %v148_v26 }
 0x13e   :  { %162 = dma.vmem_to_hbm [thread:$0]  %s158_s2, 16, %s160_s30, [#allocation4]  }
 0x13f   :  { %291 = dma.done.wait [#allocation4], 16  }
 0x140   :  { %292 = vsyncadd [#allocation4], 4294967280 }
 0x141   :  { %167 = vsyncpa [#allocation3], 1 }
 0x142   :  { %168 = vsyncpa [#allocation6], 1 }
 0x143   :  { %169 = vsyncpa [#allocation4], 1 }

</bundles_post_ra>
